<compile_context>
chip_gen: v6e
topology: v6e:2x2x1
jax: 0.10.0
libtpu: 0.0.40
codegen_flags: <defaults>
</compile_context>

<pallas_src>
import math

import jax
import jax.numpy as jnp
from jax.experimental import pallas as pl
from jax.experimental.pallas import tpu as pltpu

_LANES = 128                   # vreg lane width
_TARGET_TILE_BYTES = 2 << 20   # ~2 MiB per input tile (v6e sweet spot; safe on v5e; good on v7x)
_MIN_GRID_STEPS = 2            # ensure >=2 grid steps so v7x's two TCs both run ("parallel" axis)


def _pe_add_kernel(x_ref, pe_ref, o_ref):
    # Elementwise add; promotes if x/pe dtypes differ, then casts to the output dtype.
    o_ref[...] = (x_ref[...] + pe_ref[...]).astype(o_ref.dtype)


def make_positional_encoding_buffer(d_model, max_len=1000, dtype=jnp.float32):
    """pe buffer identical to PositionalEncoding.__init__.

    max_len is padded up (padding rows contain valid sin/cos values) so that
    (padded_max_len * d_model) % 128 == 0, keeping every forward() call on the
    lane-dense, unmasked-store path whenever seq_len * d_model % 128 == 0.
    """
    row_group = _LANES // math.gcd(d_model, _LANES)   # rows per whole 128-lane flattened row
    padded_len = ((max_len + row_group - 1) // row_group) * row_group

    position = jnp.arange(0, padded_len, dtype=jnp.float32)[:, None]            # (L, 1)
    div_term = jnp.exp(
        jnp.arange(0, d_model, 2, dtype=jnp.float32) * (-math.log(10000.0) / d_model)
    )                                                                            # (ceil(d/2),)
    angles = position * div_term                                                 # (L, ceil(d/2))
    pe = jnp.zeros((padded_len, d_model), dtype=jnp.float32)
    pe = pe.at[:, 0::2].set(jnp.sin(angles))
    pe = pe.at[:, 1::2].set(jnp.cos(angles)[:, : d_model // 2])  # guard odd d_model
    # Note: casting to a narrower dtype (e.g. bf16) rounds the buffer vs torch's f32 reference.
    return pe.astype(dtype)


def _sublane(dtype) -> int:
    # Minimum sublane multiple so packed dtypes (bf16 -> 16, int8/fp8 -> 32) avoid masked loads.
    return 8 * max(1, 4 // jnp.dtype(dtype).itemsize)


def _pick_tile(total_rows, row_bytes, sublane):
    """Largest sublane-aligned row tile near _TARGET_TILE_BYTES, with >= _MIN_GRID_STEPS steps."""
    if total_rows <= sublane:
        return total_rows
    tile = max(sublane, _TARGET_TILE_BYTES // max(1, row_bytes))
    if total_rows >= _MIN_GRID_STEPS * sublane:
        # Cap so the grid has at least _MIN_GRID_STEPS steps (work for both v7x TensorCores).
        tile = min(tile, -(-total_rows // _MIN_GRID_STEPS))
    tile = min(tile, total_rows)
    tile -= tile % sublane
    return max(sublane, tile)


def positional_encoding_forward(x, pe, *, donate_x=False):
    """forward(x) = x + pe[:seq_len, :] via a tiled, double-buffered Pallas elementwise add."""
    seq_len, d_model = x.shape
    max_len, pe_d = pe.shape
    if pe_d != d_model:
        raise ValueError(f"pe d_model {pe_d} != x d_model {d_model}")
    if seq_len > max_len:
        raise ValueError(f"seq_len {seq_len} exceeds max_len {max_len}")

    itemsize = jnp.dtype(x.dtype).itemsize
    sublane = _sublane(x.dtype)
    total = seq_len * d_model
    compiler_params = pltpu.CompilerParams(dimension_semantics=("parallel",))
    alias = {0: 0} if donate_x else {}

    # Relaxed lane-dense condition (perf review): only whole 128-lane rows are required; any
    # non-sublane-aligned / partial final block is masked by Pallas.
    lane_dense_ok = (total % _LANES == 0) and ((max_len * d_model) % _LANES == 0)

    if lane_dense_ok:
        # Lane-dense path: free row-major views as (rows, 128).  The first n_rows flattened rows
        # of pe are exactly pe[:seq_len, :] flattened, selected purely via the BlockSpec
        # index_map (no wrapper-side slab).
        n_rows = total // _LANES
        pe_rows = (max_len * d_model) // _LANES
        x_flat = x.reshape(n_rows, _LANES)
        pe_flat = pe.reshape(pe_rows, _LANES)
        tile_r = _pick_tile(n_rows, _LANES * itemsize, sublane)
        if tile_r % sublane != 0:
            # Tiny input (< one sublane group): a (tile_r, 128) block is only legal when it
            # equals the full array dims, so present pe with the same row extent as x.
            # This slice is < sublane x 128 elements -> negligible one-time copy.
            pe_flat = pe_flat[:n_rows, :]
        spec = pl.BlockSpec((tile_r, _LANES), lambda i: (i, 0))
        out_flat = pl.pallas_call(
            _pe_add_kernel,
            out_shape=jax.ShapeDtypeStruct((n_rows, _LANES), x.dtype),
            grid=(pl.cdiv(n_rows, tile_r),),
            in_specs=[spec, spec],
            out_specs=spec,
            compiler_params=compiler_params,
            input_output_aliases=alias,
        )(x_flat, pe_flat)
        return out_flat.reshape(seq_len, d_model)

    # Fallback (d_model not commensurate with 128): tile the seq axis, full d_model as the
    # (lane) last dim.  Stores are masked when d_model % 128 != 0 — acceptable escape hatch.
    tile_s = _pick_tile(seq_len, d_model * itemsize, sublane)
    pe_in = pe
    if tile_s % sublane != 0:
        # Tiny seq_len: block rows must equal the full array dim for *both* operands, so match
        # pe's row extent to x (tiny one-time slice).
        pe_in = pe[:seq_len, :]
    spec = pl.BlockSpec((tile_s, d_model), lambda i: (i, 0))
    return pl.pallas_call(
        _pe_add_kernel,
        out_shape=jax.ShapeDtypeStruct((seq_len, d_model), x.dtype),
        grid=(pl.cdiv(seq_len, tile_s),),
        in_specs=[spec, spec],
        out_specs=spec,
        compiler_params=compiler_params,
        input_output_aliases=alias,
    )(x, pe_in)


if __name__ == "__main__":
    key = jax.random.PRNGKey(0)
    k1, k2, k3 = jax.random.split(key, 3)

    # Module-consistent small shapes: d_model=32, max_len=1000.
    d_model = 32
    pe = make_positional_encoding_buffer(d_model, max_len=1000, dtype=jnp.float32)

    # Case 1: lane-dense tiled path, grid split across >=2 steps.
    seq1 = 64
    x1 = jax.random.normal(k1, (seq1, d_model), dtype=jnp.float32)
    out1 = jax.block_until_ready(positional_encoding_forward(x1, pe))
    ref1 = x1 + pe[:seq1, :]
    assert out1.shape == x1.shape and out1.dtype == x1.dtype
    assert jnp.allclose(out1, ref1, atol=1e-6, rtol=1e-6)

    # Case 2: original tiny demo shape (n_rows < sublane) — now also on the lane-dense path.
    seq2 = 8
    x2 = jax.random.normal(k2, (seq2, d_model), dtype=jnp.float32)
    out2 = jax.block_until_ready(positional_encoding_forward(x2, pe))
    assert out2.shape == x2.shape and out2.dtype == x2.dtype
    assert jnp.allclose(out2, x2 + pe[:seq2, :], atol=1e-6, rtol=1e-6)

    # Case 3: d_model not commensurate with 128 -> generic seq-tiled fallback path.
    d3, seq3 = 20, 7
    pe3 = make_positional_encoding_buffer(d3, max_len=100, dtype=jnp.float32)
    x3 = jax.random.normal(k3, (seq3, d3), dtype=jnp.float32)
    out3 = jax.block_until_ready(positional_encoding_forward(x3, pe3))
    assert out3.shape == x3.shape and out3.dtype == x3.dtype
    assert jnp.allclose(out3, x3 + pe3[:seq3, :], atol=1e-6, rtol=1e-6)

    print("KERNEL_OK")
</pallas_src>

<mosaic_0001>
module attributes {stable_mosaic.version = 11 : i64} {
  func.func @_pe_add_kernel(%arg0: i32, %arg1: memref<8x128xf32, #tpu.memory_space<vmem>>, %arg2: memref<8x128xf32, #tpu.memory_space<vmem>>, %arg3: memref<8x128xf32, #tpu.memory_space<vmem>>) attributes {dimension_semantics = [#tpu.dimension_semantics<parallel>], iteration_bounds = array<i64: 2>, scalar_prefetch = 0 : i64, scratch_operands = 0 : i64, tpu.core_type = #tpu.core_type<tc>, window_params = [{transform_indices = @transform_0, window_bounds = array<i64: 8, 128>}, {transform_indices = @transform_1, window_bounds = array<i64: 8, 128>}, {transform_indices = @transform_2, window_bounds = array<i64: 8, 128>}]} {
    %c0 = arith.constant 0 : index
    %c0_0 = arith.constant 0 : index
    %0 = vector.load %arg1[%c0, %c0_0] : memref<8x128xf32, #tpu.memory_space<vmem>>, vector<8x128xf32>
    %c0_1 = arith.constant 0 : index
    %c0_2 = arith.constant 0 : index
    %1 = vector.load %arg2[%c0_1, %c0_2] : memref<8x128xf32, #tpu.memory_space<vmem>>, vector<8x128xf32>
    %2 = arith.addf %0, %1 : vector<8x128xf32>
    %c0_3 = arith.constant 0 : index
    %c0_4 = arith.constant 0 : index
    %3 = vector.load %arg3[%c0_3, %c0_4] : memref<8x128xf32, #tpu.memory_space<vmem>>, vector<8x128xf32>
    tpu.vector_store %arg3[%c0_3, %c0_4], %2 {strides = array<i32>} : memref<8x128xf32, #tpu.memory_space<vmem>>, vector<8x128xf32>,
    return
  }
  func.func @transform_0(%arg0: i32) -> (i32, i32) {
    %c0_i32 = arith.constant 0 : i32
    %c0_i32_0 = arith.constant 0 : i32
    return %arg0, %c0_i32 : i32, i32
  }
  func.func @transform_1(%arg0: i32) -> (i32, i32) {
    %c0_i32 = arith.constant 0 : i32
    %c0_i32_0 = arith.constant 0 : i32
    return %arg0, %c0_i32 : i32, i32
  }
  func.func @transform_2(%arg0: i32) -> (i32, i32) {
    %c0_i32 = arith.constant 0 : i32
    %c0_i32_0 = arith.constant 0 : i32
    return %arg0, %c0_i32 : i32, i32
  }
}

</mosaic_0001>

<bundles_post_ra>
// kernel: tpu_custom_call.1
= control target key start
LH: loop header
LB: loop body
LE: loop exit
PB: predicated region body
PF: predicated region fallthrough
CT: control target
= control target key end

     0   :  { %7 = vsyncpa [#allocation3], 0  ;;  %s711_s0 = inlined_call_operand.hbm [shape: f32[16,128], index: 0, kind: input, shape index: {}]   ;;  %s712_s1 = inlined_call_operand.hbm [shape: f32[250,128], index: 1, kind: input, shape index: {}]   ;;  %s713_s2 = inlined_call_operand.hbm [shape: f32[16,128], index: 2, kind: output, shape index: {}]  }
   0x1   :  { %9 = vsyncpa [#allocation3 + $0x1], 0 }
   0x2   :  { %10 = vsyncpa [#allocation6], 0 }
   0x3   :  { %12 = vsyncpa [#allocation6 + $0x1], 0 }
   0x4   :  { %13 = vsyncpa [#allocation4], 0 }
   0x5   :  { %15 = vsyncpa [#allocation4 + $0x1], 0  ;;  %s517_s9 = smov 0   ;;  %s519_s10 = smov 0  }
   0x6   :  { %s521_s11 = smov 0   ;;  %s523_s12 = smov 0  }
   0x7 LB: > { %s538_s13 = sadd.s32 4294967295, %s497_s12   ;;  %s307_s14 = sadd.s32 4294967294, %s497_s12   ;;  %s497_s12 = sphi %s523_s12, %s732_s12   ;;  %s493_s11 = sphi %s521_s11, %s731_s11   ;;  %s489_s10 = sphi %s519_s10, %s730_s10   ;;  %s485_s9 = sphi %s517_s9, %s729_s9  }
   0x8   : > { %s542_s15 = sadd.s32 1, %s497_s12   ;;  %s28_s16 = sadd.s32 1, %s493_s11 }
   0x9   : > { %s25_s17 = ssub.s32 %s497_s12, %s542_s15  ;;  %p35_p0 = scmp.ne.s32.totalorder %s493_s11, %s489_s10 }
   0xa   : > { %p26_p1 = scmp.eq.s32.totalorder %s25_s17, 0  ;;  %p36_p2 = scmp.eq.s32.totalorder %s497_s12, 0 }
   0xb   : > { %p41_p3 = scmp.ne.s32.totalorder %s489_s10, %s485_s9  ;;  %p42_p4 = scmp.eq.s32.totalorder %s538_s13, 0 }
   0xc   : > { %s554_s18 = scalar_select %p26_p1, %s493_s11, %s28_s16  }
   0xd   : > { %p556_p5 = por %p36_p2, %p35_p0  ;;  %p560_p6 = por %p42_p4, %p41_p3 }
   0xe   : > { %p91_p7 = scmp.eq.s32.totalorder %s538_s13, 1  ;;  %p97_p8 = scmp.eq.s32.totalorder %s307_s14, 1 }
   0xf   : > { %s717_s20 = scalar_select %p560_p6, 1, 0 }
  0x10   : > { %p339_p10 = scmp.lt.s32.totalorder %s497_s12, 2  ;;  %p567_p11 = por %p91_p7, %p35_p0 }
  0x11   : > { %p571_p12 = por %p97_p8, %p41_p3  ;;  %s576_s23 = sand.u32 1, %s493_s11  }
  0x12   : > { %s718_s21 = scalar_select %p567_p11, 1, 0 }
  0x13   : > { %s719_s22 = scalar_select %p571_p12, 1, 0 }
  0x14   : > { %s311_s24 = sshll.u32 %s497_s12, 7  ;;  %s310_s25 = sshll.u32 %s576_s23, 3 }
  0x15   : > { %s585_s28 = scalar_lea.hbm %s711_s0, %s311_s24  ;;  %s121_s29 = scalar_lea.vmem [#allocation2], %s310_s25 }
  0x16   : > { %s128_s30 = sshll.u32 %s121_s29, 4  ;;  %p591_p13 = pnand %p339_p10, %p556_p5  ;;  %s595_s30 = int_to_ptr.vmem [resolvable:$true] %s128_s30 }
  0x17   : > { %s118_s4 = scalar_lea.sflag [#allocation3], %s576_s23  ;;  %s373_s5 = scalar_lea.hbm %s585_s28, 128 }
  0x18   : > { %p374_p2 = scmp.ne.s32.totalorder %s585_s28, %s373_s5  ;;  %p375_p3 = pneg %p591_p13 }
  0x19   : > { %s378_s8 = scalar_lea.hbm %s711_s0, 256  ;;  %p379_p5 = scmp.lt.s32.totalorder %s585_s28, %s711_s0 }
  0x1a   : > { %p376_p4 = pnand %p375_p3, %p374_p2  ;;  %p380_p8 = scmp.lt.s32.totalorder %s378_s8, %s373_s5 }
  0x1c   : > { %p377_p7 = pneg %p376_p4  ;;  %p381_p10 = por %p380_p8, %p379_p5 }
  0x1e   : > { %p382_p9 = pnand %p381_p10, %p377_p7 }
  0x20   : > { %385 = shalt.err (!%p382_p9)
}
  0x21   : > { %s386_s17 = scalar_lea.vmem %s595_s30, 128  ;;  %s499_s19 = smov [#allocation2]  }
  0x22   : > { %p387_p0 = scmp.ne.s32.totalorder %s595_s30, %s386_s17  ;;  %s391_s26 = sshll.u32 %s499_s19, 4  ;;  %s392_s26 = int_to_ptr.vmem [resolvable:$false] %s391_s26 }
  0x23   : > { %s393_s27 = scalar_lea.vmem %s392_s26, 256  ;;  %p394_p1 = scmp.lt.s32.totalorder %s595_s30, %s392_s26 }
  0x24   : > { %p389_p2 = pnand %p387_p0, %p375_p3  ;;  %p395_p12 = scmp.lt.s32.totalorder %s393_s27, %s386_s17 }
  0x26   : > { %p390_p4 = pneg %p389_p2  ;;  %p396_p11 = por %p395_p12, %p394_p1 }
  0x28   : > { %p397_p5 = pnand %p396_p11, %p390_p4 }
  0x2a   : > { %400 = shalt.err (!%p397_p5)
}
  0x2b   : > { %331 = dma.hbm_to_vmem [thread:$0]  (!%p591_p13), %s585_s28, 128, %s595_s30, %s118_s4  }
  0x2c   : > { %p721_p9 = scmp.lt.s32.totalorder %s497_s12, 3  ;;  %p722_p0 = scmp.ge.s32.totalorder %s497_s12, 1 }
  0x2d   : > { %s637_s7 = scalar_lea.hbm %s712_s1, %s311_s24  ;;  %s139_s8 = scalar_lea.vmem [#allocation5], %s310_s25 }
  0x2e   : > { %p628_p7 = pnand %p722_p0, %p721_p9  ;;  %s146_s14 = sshll.u32 %s139_s8, 4  ;;  %s147_s14 = int_to_ptr.vmem [resolvable:$true] %s146_s14 }
  0x2f   : > { %s136_s28 = scalar_lea.sflag [#allocation6], %s576_s23  ;;  %s401_s30 = scalar_lea.hbm %s637_s7, 128 }
  0x30   : > { %s723_s29 = scalar_select %p628_p7, 1, 0 }
  0x31   : > { %p402_p11 = scmp.ne.s32.totalorder %s637_s7, %s401_s30  ;;  %s406_s17 = scalar_lea.hbm %s712_s1, 4096 }
  0x32   : > { %p407_p8 = scmp.lt.s32.totalorder %s637_s7, %s712_s1  ;;  %p408_p10 = scmp.lt.s32.totalorder %s406_s17, %s401_s30 }
  0x33   : > { %p404_p12 = pnand %p402_p11, %p375_p3 }
  0x34   : > { %p409_p2 = por %p408_p10, %p407_p8 }
  0x35   : > { %p405_p1 = pneg %p404_p12 }
  0x37   : > { %p410_p4 = pnand %p409_p2, %p405_p1 }
  0x39   : > { %413 = shalt.err (!%p410_p4)
}
  0x3a   : > { %s414_s25 = scalar_lea.vmem %s147_s14, 128  ;;  %s500_s23 = smov [#allocation5]  }
  0x3b   : > { %p415_p5 = scmp.ne.s32.totalorder %s147_s14, %s414_s25  ;;  %s419_s26 = sshll.u32 %s500_s23, 4  ;;  %s420_s26 = int_to_ptr.vmem [resolvable:$false] %s419_s26 }
  0x3c   : > { %s421_s27 = scalar_lea.vmem %s420_s26, 256  ;;  %p422_p11 = scmp.lt.s32.totalorder %s147_s14, %s420_s26 }
  0x3d   : > { %p417_p9 = pnand %p415_p5, %p375_p3  ;;  %p423_p12 = scmp.lt.s32.totalorder %s421_s27, %s414_s25 }
  0x3f   : > { %p418_p0 = pneg %p417_p9  ;;  %p424_p6 = por %p423_p12, %p422_p11 }
  0x41   : > { %p425_p7 = pnand %p424_p6, %p418_p0 }
  0x43   : > { %428 = shalt.err (!%p425_p7)
}
  0x44   : > { %334 = dma.hbm_to_vmem [thread:$0]  (!%p591_p13), %s637_s7, 128, %s147_s14, %s136_s28  }
  0x45   : > { %p724_p1 = scmp.ne.s32.totalorder %s723_s29, 0 }
  0x46   : > { %s663_s5 = sand.u32 (!%p724_p1), 1, %s489_s10   ;;  %p725_p3 = scmp.ne.s32.totalorder (!%p724_p1), %s717_s20, 0 }
  0x47   : > { %155 = sbr.rel (%p724_p1) target bundleno = 104 (0x68), region = 28  ;;  %s315_s6 = sshll.u32 (!%p724_p1), %s663_s5, 3 }
  0x48   : > { %s158_s8 = scalar_lea.sflag (!%p724_p1), [#allocation3], %s663_s5  ;;  %s161_s30 = scalar_lea.vmem (!%p724_p1), [#allocation2], %s315_s6 }
  0x4c   : > { %472 = dma.done.wait (%p725_p3), %s158_s8, 128  }
  0x4d   : > { %474 = vsyncadd (%p725_p3), %s158_s8, 4294967168  ;;  %s167_s3 = scalar_lea.sflag [#allocation6], %s663_s5  ;;  %s170_s7 = scalar_lea.vmem [#allocation5], %s315_s6 }
  0x4e   : > { %476 = dma.done.wait (%p725_p3), %s167_s3, 128  }
  0x4f   : > { %478 = vsyncadd (%p725_p3), %s167_s3, 4294967168  ;;  %s195_s29 = scalar_lea.vmem [#allocation7], %s315_s6  ;;  %s319_s28 = sshll.u32 %s538_s13, 7  ;;  %v196_v0 = vld [vmem:[%s161_s30] sm:$0xff]  ;;  %v197_v1 = vld [vmem:[%s170_s7] sm:$0xff] }
  0x50   : > { %s214_s14 = sshll.u32 %s195_s29, 4  ;;  %v198_v2 = vadd.f32 %v197_v1, %v196_v0  ;;  %s212_s17 = scalar_lea.hbm %s713_s2, %s319_s28  ;;  %s215_s14 = int_to_ptr.vmem [resolvable:$true] %s214_s14 }
  0x51   : > { %s201_s24 = scalar_lea.sflag [#allocation4], %s663_s5  ;;  %s429_s19 = scalar_lea.vmem %s215_s14, 128 }
  0x52   : > { %199 = vst [vmem:[%s195_s29] sm:$0xff] %v198_v2  ;;  %p430_p6 = scmp.ne.s32.totalorder %s215_s14, %s429_s19  ;;  %p726_p13 = scmp.ne.s32.totalorder %s718_s21, 0 }
  0x53   : > { %s501_s20 = smov [#allocation7]  }
  0x54   : > { %p431_p7 = pnand %p430_p6, %p726_p13  ;;  %s433_s25 = sshll.u32 %s501_s20, 4  ;;  %s434_s25 = int_to_ptr.vmem [resolvable:$false] %s433_s25 }
  0x55   : > { %s435_s23 = scalar_lea.vmem %s434_s25, 256  ;;  %p436_p10 = scmp.lt.s32.totalorder %s215_s14, %s434_s25 }
  0x56   : > { %p432_p8 = pneg %p431_p7  ;;  %p437_p2 = scmp.lt.s32.totalorder %s435_s23, %s429_s19 }
  0x58   : > { %p438_p4 = por %p437_p2, %p436_p10 }
  0x5a   : > { %p439_p5 = pnand %p438_p4, %p432_p8 }
  0x5c   : > { %442 = shalt.err (!%p439_p5)
}
  0x5d   : > { %s443_s13 = scalar_lea.hbm %s212_s17, 128  ;;  %s447_s5 = scalar_lea.hbm %s713_s2, 256 }
  0x5e   : > { %p444_p9 = scmp.ne.s32.totalorder %s212_s17, %s443_s13  ;;  %p448_p12 = scmp.lt.s32.totalorder %s212_s17, %s713_s2 }
  0x5f   : > { %p449_p1 = scmp.lt.s32.totalorder %s447_s5, %s443_s13 }
  0x60   : > { %p445_p0 = pnand %p444_p9, %p726_p13 }
  0x61   : > { %p450_p3 = por %p449_p1, %p448_p12 }
  0x62   : > { %p446_p11 = pneg %p445_p0 }
  0x64   : > { %p451_p6 = pnand %p450_p3, %p446_p11 }
  0x66   : > { %454 = shalt.err (!%p451_p6)
}
  0x67   : > { %326 = dma.vmem_to_hbm [thread:$0]  (%p726_p13), %s215_s14, 128, %s212_s17, %s201_s24  }
  0x68 PF: > { %s226_s30 = sand.u32 1, %s485_s9   ;;  %p727_p7 = scmp.ne.s32.totalorder %s719_s22, 0 }
  0x69   : > { %p728_p8 = scmp.ge.s32.totalorder %s497_s12, 2  ;;  %s227_s3 = scalar_lea.sflag [#allocation4], %s226_s30 }
  0x6b   : > { %p336_p10 = pnand %p728_p8, %p727_p7 }
  0x6d   : > { %p337_p2 = pneg %p336_p10 }
  0x6f   : > { %480 = dma.done.wait (%p337_p2), %s227_s3, 128  }
  0x70   : > { %482 = vsyncadd (%p337_p2), %s227_s3, 4294967168  ;;  %p18_p4 = scmp.ge.s32.totalorder %s542_s15, 4   ;;  %s729_s9 = smov %s489_s10 }
  0x71   : > { %s730_s10 = smov %s493_s11  ;;  %s731_s11 = smov %s554_s18 }
  0x72   : > { %s732_s12 = smov %s542_s15  ;;  %20 = sbr.rel (!%p18_p4) target bundleno = 7 (0x7), region = 86 }
  0x77   :  { %232 = vsyncpa [#allocation3], 1 }
  0x78   :  { %234 = vsyncpa [#allocation3 + $0x1], 1 }
  0x79   :  { %235 = vsyncpa [#allocation6], 1 }
  0x7a   :  { %237 = vsyncpa [#allocation6 + $0x1], 1 }
  0x7b   :  { %238 = vsyncpa [#allocation4], 1 }
  0x7c   :  { %240 = vsyncpa [#allocation4 + $0x1], 1 }

</bundles_post_ra>
